<compile_context>
chip_gen: v7x
topology: tpu7x:2x2x1
jax: 0.10.0
libtpu: 0.0.40
codegen_flags: <defaults>
</compile_context>

<pallas_src>
import jax
import jax.numpy as jnp
from jax.experimental import pallas as pl
from jax.experimental.pallas import tpu as pltpu


INPUT_SIZE = 64
HIDDEN_SIZE = 37
OUTPUT_SIZE = 10

LANE = 128             # TPU lane width: hidden dim padded to this for MXU tiles
SUBLANE_BF16 = 16      # bf16 sublane packing for the streamed X tile
TB_MAX = 8192          # max batch-tile rows (~13 MiB live VMEM incl. intermediates)
MIN_SPLIT_ROWS = 1024  # force >= 2 grid steps above 2*this (v7x dual-TC sharding)
VMEM_LIMIT_BYTES = 48 * 1024 * 1024


def _cdiv(a, b):
    return -(-a // b)


def _round_up(x, m):
    return ((x + m - 1) // m) * m


def _sigmoid(s):
    # sigmoid(s) == 0.5 * (1 + tanh(s/2)): a single EUP transcendental plus
    # cheap VPU mul/add; exact (no approx reciprocal) and no exp overflow.
    return 0.5 * (1.0 + jnp.tanh(0.5 * s))


def mlp_forward_kernel(x_ref, w1_ref, w2_ref, o_ref):
    # X streams in as bf16 (half the HBM read bytes); weights are tiny f32
    # VMEM-resident blocks, and both matmuls accumulate in f32 on the MXU.
    x = x_ref[...].astype(jnp.float32)                                   # (tb, 64)
    z = jnp.dot(x, w1_ref[...], preferred_element_type=jnp.float32)      # (tb, 128)
    z2 = _sigmoid(z)
    z3 = jnp.dot(z2, w2_ref[...], preferred_element_type=jnp.float32)    # (tb, 10)
    o_ref[...] = _sigmoid(z3).astype(o_ref.dtype)


def prepare_params(w1, w2):
    """Pad/cast weights once (hoisted out of the per-call forward path).

    W1's hidden dim is zero-padded to 128 lanes (lane-dense MXU tile). The
    matching padded rows of W2 are zero, so the padded hidden activations
    (sigmoid(0) = 0.5) contribute nothing. W2 keeps its TRUE output width (10)
    so the kernel writes back only 40 B/row instead of a padded 512 B/row.
    """
    in_size, hidden = w1.shape
    out = w2.shape[1]
    hidden_p = _round_up(hidden, LANE)
    w1_p = jnp.zeros((in_size, hidden_p), jnp.float32).at[:, :hidden].set(
        w1.astype(jnp.float32))
    w2_p = jnp.zeros((hidden_p, out), jnp.float32).at[:hidden, :].set(
        w2.astype(jnp.float32))
    return w1_p, w2_p


def _choose_tiling(batch):
    # Pad batch only to the bf16 sublane multiple (16), never to a whole tile.
    # Keep >= 2 grid steps for large batches so the "parallel" axis can shard
    # across v7x's two TensorCores (and megacore on v5e/v6e does no harm).
    batch_a = _round_up(max(batch, 1), SUBLANE_BF16)
    n_tiles = _cdiv(batch_a, TB_MAX)
    if batch_a >= 2 * MIN_SPLIT_ROWS:
        n_tiles = max(n_tiles, 2)
    tb = _round_up(_cdiv(batch_a, n_tiles), SUBLANE_BF16)
    batch_p = n_tiles * tb
    return tb, batch_p, n_tiles


@jax.jit
def neural_network_forward(x, w1_p, w2_p):
    batch, in_size = x.shape
    hidden_p = w1_p.shape[1]
    out = w2_p.shape[1]

    tb, batch_p, n_tiles = _choose_tiling(batch)

    x_p = x.astype(jnp.bfloat16)
    if batch_p != batch:
        x_p = jnp.pad(x_p, ((0, batch_p - batch), (0, 0)))

    out_padded = pl.pallas_call(
        mlp_forward_kernel,
        out_shape=jax.ShapeDtypeStruct((batch_p, out), jnp.float32),
        grid=(n_tiles,),
        in_specs=[
            # X tile streams over the batch grid axis (auto double-buffered DMA)
            pl.BlockSpec((tb, in_size), lambda i: (i, 0)),
            # Weights: same block every step -> VMEM-resident across the grid
            pl.BlockSpec((in_size, hidden_p), lambda i: (0, 0)),
            pl.BlockSpec((hidden_p, out), lambda i: (0, 0)),
        ],
        # True output width (10): 12.8x less writeback than a 128-lane pad.
        out_specs=pl.BlockSpec((tb, out), lambda i: (i, 0)),
        compiler_params=pltpu.CompilerParams(
            dimension_semantics=("parallel",),
            vmem_limit_bytes=VMEM_LIMIT_BYTES),
    )(x_p, w1_p, w2_p)

    # Slice away the (<=15 row) batch padding.
    return out_padded[:batch, :]


def reference_forward(x, w1, w2):
    z2 = 1.0 / (1.0 + jnp.exp(-(x @ w1)))
    return 1.0 / (1.0 + jnp.exp(-(z2 @ w2)))


if __name__ == "__main__":
    batch = 8

    key = jax.random.PRNGKey(0)
    kx, kw1, kw2 = jax.random.split(key, 3)

    # Deterministic synthetic parameters (torch.randn equivalents)
    X = jax.random.normal(kx, (batch, INPUT_SIZE), dtype=jnp.float32)
    W1 = jax.random.normal(kw1, (INPUT_SIZE, HIDDEN_SIZE), dtype=jnp.float32)
    W2 = jax.random.normal(kw2, (HIDDEN_SIZE, OUTPUT_SIZE), dtype=jnp.float32)

    w1_p, w2_p = prepare_params(W1, W2)
    out = neural_network_forward(X, w1_p, w2_p)
    out = jax.block_until_ready(out)

    ref = reference_forward(X, W1, W2)
    assert out.shape == (batch, OUTPUT_SIZE)
    # Tolerance covers the bf16 streaming of X (weights and accumulation stay
    # f32, sigmoid is the exact tanh form).
    assert jnp.allclose(out, ref, atol=3e-2, rtol=0.0), "mismatch vs reference"

    print("KERNEL_OK")
</pallas_src>

<mosaic_0001>
module attributes {stable_mosaic.version = 11 : i64} {
  func.func @mlp_forward_kernel(%arg0: i32, %arg1: memref<16x64xbf16, #tpu.memory_space<vmem>>, %arg2: memref<64x128xf32, #tpu.memory_space<vmem>>, %arg3: memref<128x10xf32, #tpu.memory_space<vmem>>, %arg4: memref<16x10xf32, #tpu.memory_space<vmem>>) attributes {dimension_semantics = [#tpu.dimension_semantics<parallel>], iteration_bounds = array<i64: 1>, scalar_prefetch = 0 : i64, scratch_operands = 0 : i64, tpu.core_type = #tpu.core_type<tc>, window_params = [{transform_indices = @transform_0, window_bounds = array<i64: 16, 64>}, {pipeline_mode = #tpu.pipeline_mode<synchronous>, transform_indices = @transform_1, window_bounds = array<i64: 64, 128>}, {pipeline_mode = #tpu.pipeline_mode<synchronous>, transform_indices = @transform_2, window_bounds = array<i64: 128, 10>}, {transform_indices = @transform_3, window_bounds = array<i64: 16, 10>}]} {
    %c0 = arith.constant 0 : index
    %c0_0 = arith.constant 0 : index
    %0 = vector.load %arg1[%c0, %c0_0] : memref<16x64xbf16, #tpu.memory_space<vmem>>, vector<16x64xbf16>
    %1 = arith.extf %0 : vector<16x64xbf16> to vector<16x64xf32>
    %c0_1 = arith.constant 0 : index
    %c0_2 = arith.constant 0 : index
    %2 = vector.load %arg2[%c0_1, %c0_2] : memref<64x128xf32, #tpu.memory_space<vmem>>, vector<64x128xf32>
    %cst = arith.constant dense<0.000000e+00> : vector<16x128xf32>
    %3 = tpu.matmul %1, %2, %cst {dimension_numbers = #tpu.dot_dimension_numbers<[1], [0], [0], [1], [0, 0, 1, 1], [], []>} : vector<16x64xf32>, vector<64x128xf32>, vector<16x128xf32> -> vector<16x128xf32>
    %cst_3 = arith.constant 5.000000e-01 : f32
    %4 = vector.broadcast %cst_3 : f32 to vector<16x128xf32>
    %5 = arith.mulf %4, %3 : vector<16x128xf32>
    %6 = math.tanh %5 : vector<16x128xf32>
    %cst_4 = arith.constant 1.000000e+00 : f32
    %7 = vector.broadcast %cst_4 : f32 to vector<16x128xf32>
    %8 = arith.addf %7, %6 : vector<16x128xf32>
    %cst_5 = arith.constant 5.000000e-01 : f32
    %9 = vector.broadcast %cst_5 : f32 to vector<16x128xf32>
    %10 = arith.mulf %9, %8 : vector<16x128xf32>
    %c0_6 = arith.constant 0 : index
    %c0_7 = arith.constant 0 : index
    %11 = vector.load %arg3[%c0_6, %c0_7] : memref<128x10xf32, #tpu.memory_space<vmem>>, vector<128x10xf32>
    %cst_8 = arith.constant dense<0.000000e+00> : vector<16x10xf32>
    %12 = tpu.matmul %10, %11, %cst_8 {dimension_numbers = #tpu.dot_dimension_numbers<[1], [0], [0], [1], [0, 0, 1, 1], [], []>} : vector<16x128xf32>, vector<128x10xf32>, vector<16x10xf32> -> vector<16x10xf32>
    %cst_9 = arith.constant 5.000000e-01 : f32
    %13 = vector.broadcast %cst_9 : f32 to vector<16x10xf32>
    %14 = arith.mulf %13, %12 : vector<16x10xf32>
    %15 = math.tanh %14 : vector<16x10xf32>
    %cst_10 = arith.constant 1.000000e+00 : f32
    %16 = vector.broadcast %cst_10 : f32 to vector<16x10xf32>
    %17 = arith.addf %16, %15 : vector<16x10xf32>
    %cst_11 = arith.constant 5.000000e-01 : f32
    %18 = vector.broadcast %cst_11 : f32 to vector<16x10xf32>
    %19 = arith.mulf %18, %17 : vector<16x10xf32>
    %c0_12 = arith.constant 0 : index
    %c0_13 = arith.constant 0 : index
    %20 = vector.load %arg4[%c0_12, %c0_13] : memref<16x10xf32, #tpu.memory_space<vmem>>, vector<16x10xf32>
    tpu.vector_store %arg4[%c0_12, %c0_13], %19 {strides = array<i32>} : memref<16x10xf32, #tpu.memory_space<vmem>>, vector<16x10xf32>,
    return
  }
  func.func @transform_0(%arg0: i32) -> (i32, i32) {
    %c0_i32 = arith.constant 0 : i32
    %c0_i32_0 = arith.constant 0 : i32
    return %arg0, %c0_i32 : i32, i32
  }
  func.func @transform_1(%arg0: i32) -> (i32, i32) {
    %c0_i32 = arith.constant 0 : i32
    %c0_i32_0 = arith.constant 0 : i32
    %c0_i32_1 = arith.constant 0 : i32
    return %c0_i32, %c0_i32_0 : i32, i32
  }
  func.func @transform_2(%arg0: i32) -> (i32, i32) {
    %c0_i32 = arith.constant 0 : i32
    %c0_i32_0 = arith.constant 0 : i32
    %c0_i32_1 = arith.constant 0 : i32
    return %c0_i32, %c0_i32_0 : i32, i32
  }
  func.func @transform_3(%arg0: i32) -> (i32, i32) {
    %c0_i32 = arith.constant 0 : i32
    %c0_i32_0 = arith.constant 0 : i32
    return %arg0, %c0_i32 : i32, i32
  }
}

</mosaic_0001>

<bundles_post_ra>
// kernel: neural_network_forward.1
= control target key start
LH: loop header
LB: loop body
LE: loop exit
PB: predicated region body
PF: predicated region fallthrough
CT: control target
= control target key end

     0   :  { %vm26_vm0 = vcmask 523264   ;;  %vm215_vm1 = vcmask 80896   ;;  %s469_s1 = inlined_call_operand.vmem [shape: f32[64,128], index: 1, kind: input, shape index: {}]   ;;  %s470_s0 = inlined_call_operand.vmem [shape: bf16[16,64], index: 0, kind: input, shape index: {}]   ;;  %s471_s2 = inlined_call_operand.vmem [shape: f32[128,10], index: 2, kind: input, shape index: {}]   ;;  %s472_s3 = inlined_call_operand.vmem [shape: f32[16,10], index: 3, kind: output, shape index: {}]  }
   0x1   :  { %v18_v0 = vld [vmem:[%s469_s1] sm:$0xff]  ;;  %v19_v1 = vld [vmem:[%s469_s1 + $0x8] sm:$0xff]  ;;  %v20_v2 = vld [vmem:[%s469_s1 + $0x10] sm:$0xff] }
   0x2   :  { %v310_v3 = vpack.c.bf16 %v19_v1, %v18_v0  ;;  %v21_v4 = vld [vmem:[%s469_s1 + $0x18] sm:$0xff]  ;;  %v22_v6 = vld [vmem:[%s469_s1 + $0x20] sm:$0xff]  ;;  %v23_v7 = vld [vmem:[%s469_s1 + $0x28] sm:$0xff] }
   0x3   :  { %v314_v5 = vpack.c.bf16 %v21_v4, %v20_v2  ;;  %v225_v8 = vld [vmem:[%s470_s0] sm:$0xff]   ;;  %v117_v11 = vld [vmem:[%s471_s2 + $0x8] sm:$0xff]  ;;  %v118_v12 = vld [vmem:[%s471_s2 + $0x10] sm:$0xff]  ;;  %v318_v15 = vpack.c.bf16 %v23_v7, %v22_v6 }
   0x4   :  { %311 = vmatprep.subr.bf16.mxu0 %v310_v3  ;;  %v226_v9 = vunpack.c.l.bf16 %v225_v8  ;;  %v116_v10 = vld [vmem:[%s471_s2] sm:$0xff]  ;;  %v119_v14 = vld [vmem:[%s471_s2 + $0x18] sm:$0xff]  ;;  %v121_v18 = vld [vmem:[%s471_s2 + $0x28] sm:$0xff]  ;;  %v227_v23 = vunpack.c.h.bf16 %v225_v8 }
   0x5   :  { %313 = vmatpush3.bf16.msra.mxu0 %v310_v3  ;;  %v326_v13 = vpack.c.bf16 %v117_v11, %v116_v10  ;;  %v330_v16 = vpack.c.bf16 %v119_v14, %v118_v12  ;;  %v120_v17 = vld [vmem:[%s471_s2 + $0x20] sm:$0xff]  ;;  %v24_v19 = vld [vmem:[%s469_s1 + $0x30] sm:$0xff]  ;;  %v25_v20 = vld [vmem:[%s469_s1 + $0x38] sm:$0xff] }
   0x6   :  { %315 = vmatprep.subr.bf16.mxu0 %v314_v5  ;;  %272 = vmatprep.mubr.msk.f32.mxu0 %vm26_vm0, %v226_v9  ;;  %v334_v21 = vpack.c.bf16 %v121_v18, %v120_v17  ;;  %v322_v22 = vpack.c.bf16 %v25_v20, %v24_v19  ;;  %v122_v24 = vld [vmem:[%s471_s2 + $0x30] sm:$0xff]  ;;  %v123_v25 = vld [vmem:[%s471_s2 + $0x38] sm:$0xff]  ;;  %v124_v27 = vld [vmem:[%s471_s2 + $0x40] sm:$0xff] }
   0x7   :  { %327 = vmatprep.subr.bf16.mxu1 %v326_v13  ;;  %v338_v26 = vpack.c.bf16 %v123_v25, %v122_v24  ;;  %v125_v28 = vld [vmem:[%s471_s2 + $0x48] sm:$0xff]  ;;  %v126_v30 = vld [vmem:[%s471_s2 + $0x50] sm:$0xff]  ;;  %v127_v31 = vld [vmem:[%s471_s2 + $0x58] sm:$0xff] }
   0x8   :  { %329 = vmatpush3.bf16.msra.mxu1 %v326_v13  ;;  %v342_v29 = vpack.c.bf16 %v125_v28, %v124_v27  ;;  %v346_v32 = vpack.c.bf16 %v127_v31, %v126_v30  ;;  %v128_v33 = vld [vmem:[%s471_s2 + $0x60] sm:$0xff]  ;;  %v129_v34 = vld [vmem:[%s471_s2 + $0x68] sm:$0xff]  ;;  %v130_v36 = vld [vmem:[%s471_s2 + $0x70] sm:$0xff] }
   0x9   :  { %317 = vmatpush3.bf16.msra.mxu0 %v314_v5  ;;  %331 = vmatprep.subr.bf16.mxu1 %v330_v16  ;;  %v350_v35 = vpack.c.bf16 %v129_v34, %v128_v33  ;;  %v131_v37 = vld [vmem:[%s471_s2 + $0x78] sm:$0xff] }
   0xa   :  { %319 = vmatprep.subr.bf16.mxu0 %v318_v15  ;;  %v354_v38 = vpack.c.bf16 %v131_v37, %v130_v36 }
   0xc   :  { %333 = vmatpush3.bf16.msra.mxu1 %v330_v16 }
   0xd   :  { %321 = vmatpush3.bf16.msra.mxu0 %v318_v15  ;;  %335 = vmatprep.subr.bf16.mxu1 %v334_v21 }
   0xe   :  { %323 = vmatprep.subr.bf16.mxu0 %v322_v22 }
  0x10   :  { %337 = vmatpush3.bf16.msra.mxu1 %v334_v21 }
  0x11   :  { %325 = vmatpush3.bf16.msra.mxu0 %v322_v22  ;;  %339 = vmatprep.subr.bf16.mxu1 %v338_v26 }
  0x14   :  { %273 = vmatmul.mubr.msk.f32.vlgmr.msra.gmra.mrb[0].mxu0 %vm26_vm0, %v227_v23  ;;  %341 = vmatpush3.bf16.msra.mxu1 %v338_v26 }
  0x15   :  { %343 = vmatprep.subr.bf16.mxu1 %v342_v29 }
  0x18   :  { %345 = vmatpush3.bf16.msra.mxu1 %v342_v29 }
  0x19   :  { %347 = vmatprep.subr.bf16.mxu1 %v346_v32 }
  0x1c   :  { %349 = vmatpush3.bf16.msra.mxu1 %v346_v32 }
  0x1d   :  { %351 = vmatprep.subr.bf16.mxu1 %v350_v35 }
  0x20   :  { %353 = vmatpush3.bf16.msra.mxu1 %v350_v35 }
  0x21   :  { %355 = vmatprep.subr.bf16.mxu1 %v354_v38 }
  0x24   :  { %357 = vmatpush3.bf16.msra.mxu1 %v354_v38 }
  0xe7   :  { %v274_v39 = vpop.f32.mrb[0].mxu0 }
  0xe8   :  { %v109_v40 = vmul.f32 0.5, %v274_v39  ;;  %v99_v41 = vpop.f32.mrb[1].mxu0 }
  0xe9   :  { %v108_v42 = vmul.f32 0.5, %v99_v41 }
  0xea   :  { %358 = vtanh.f32 %v109_v40 }
  0xeb   :  { %360 = vtanh.f32 %v108_v42 }
  0xf4   :  { %v359_v43 = vpop.eup %358 }
  0xf5   :  { %v361_v44 = vpop.eup %360  ;;  %v113_v45 = vadd.f32 1.0, %v359_v43 }
  0xf6   :  { %v112_v46 = vadd.f32 1.0, %v361_v44 }
  0xf7   :  { %v115_v48 = vmul.f32 0.5, %v113_v45 }
  0xf8   :  { %v114_v47 = vmul.f32 0.5, %v112_v46 }
  0xfa   :  { %307 = vmatprep.mubr.f32.mxu1 %v114_v47 }
  0xfb   :  { %308 = vmatmul.mubr.f32.vlgmr.msra.gmra.mrb[0].mxu1 %v115_v48 }
 0x1ce   :  { %v309_v49 = vpop.f32.mrb[0].mxu1 }
 0x1cf   :  { %v208_v50 = vmul.f32 0.5, %v309_v49  ;;  %v198_v51 = vpop.f32.mrb[1].mxu1 }
 0x1d0   :  { %v207_v52 = vmul.f32 0.5, %v198_v51 }
 0x1d1   :  { %362 = vtanh.f32 %v208_v50 }
 0x1d2   :  { %364 = vtanh.f32 %v207_v52 }
 0x1db   :  { %v363_v53 = vpop.eup %362 }
 0x1dc   :  { %v365_v54 = vpop.eup %364  ;;  %v212_v55 = vadd.f32 1.0, %v363_v53 }
 0x1dd   :  { %v211_v56 = vadd.f32 1.0, %v365_v54 }
 0x1de   :  { %v214_v57 = vmul.f32 0.5, %v212_v55 }
 0x1df   :  { %v213_v58 = vmul.f32 0.5, %v211_v56 }
 0x1e0   :  { %217 = vst.msk [vmem:[%s472_s3 + $0x8] sm:$0xff] %vm215_vm1, %v214_v57 }
 0x1e1   :  { %216 = vst.msk [vmem:[%s472_s3] sm:$0xff] %vm215_vm1, %v213_v58 }

</bundles_post_ra>
